<compile_context>
chip_gen: v7x
topology: tpu7x:2x2x1
jax: 0.10.0
libtpu: 0.0.40
codegen_flags: <defaults>
</compile_context>

<pallas_src>
import math
from functools import partial

import numpy as np
import jax
import jax.numpy as jnp
from jax import lax
from jax.experimental import pallas as pl
from jax.experimental.pallas import tpu as pltpu


# ----------------------------------------------------------------------------
# sin-cos positional embeddings (numpy, identical math to the reference)
# ----------------------------------------------------------------------------
def get_1d_sincos_pos_embed_from_grid(embed_dim, pos):
    assert embed_dim % 2 == 0
    omega = np.arange(embed_dim // 2, dtype=np.float64)
    omega /= embed_dim / 2.0
    omega = 1.0 / 10000 ** omega
    pos = pos.reshape(-1)
    out = np.einsum('m,d->md', pos, omega)
    return np.concatenate([np.sin(out), np.cos(out)], axis=1)


def get_2d_sincos_pos_embed_from_grid(embed_dim, grid):
    assert embed_dim % 2 == 0
    emb_h = get_1d_sincos_pos_embed_from_grid(embed_dim // 2, grid[0])
    emb_w = get_1d_sincos_pos_embed_from_grid(embed_dim // 2, grid[1])
    return np.concatenate([emb_h, emb_w], axis=1)


def get_2d_sincos_pos_embed(embed_dim, grid_size, cls_token=False):
    grid_h = np.arange(grid_size, dtype=np.float32)
    grid_w = np.arange(grid_size, dtype=np.float32)
    grid = np.meshgrid(grid_w, grid_h)
    grid = np.stack(grid, axis=0).reshape([2, 1, grid_size, grid_size])
    pos_embed = get_2d_sincos_pos_embed_from_grid(embed_dim, grid)
    if cls_token:
        pos_embed = np.concatenate([np.zeros([1, embed_dim]), pos_embed], axis=0)
    return pos_embed


# ----------------------------------------------------------------------------
# Generation-aware configuration (v5e / v6e: 128 MiB VMEM, v7x: 64 MiB)
# ----------------------------------------------------------------------------
def _tpu_vmem_bytes():
    try:
        return int(pltpu.get_tpu_info().vmem_capacity_bytes)
    except Exception:
        return 64 * 1024 * 1024


_VMEM_BYTES = _tpu_vmem_bytes()
_MAX_ROW_TILE = 512 if _VMEM_BYTES >= (96 << 20) else 256      # smaller row tiles on v7x
_VMEM_LIMIT = int(min(_VMEM_BYTES // 2, 100 << 20))            # raises v5e's 16 MiB scoped default


def _cparams(sem):
    return pltpu.CompilerParams(dimension_semantics=sem, vmem_limit_bytes=_VMEM_LIMIT)


def _round_up(x, m):
    return ((x + m - 1) // m) * m


def _rows_plan(M):
    """Pick a row tile (multiple of 8) and the padded row count it divides."""
    tm = min(_MAX_ROW_TILE, _round_up(M, 8))
    return tm, _round_up(M, tm)


def _pad_rows(x, M_pad):
    M = x.shape[0]
    if M_pad == M:
        return x
    return jnp.pad(x, ((0, M_pad - M), (0, 0)))


# ----------------------------------------------------------------------------
# In-kernel math helpers (f32)
# ----------------------------------------------------------------------------
_LN_EPS = 1e-5


def _layernorm(x, g, b):
    mu = jnp.mean(x, axis=-1, keepdims=True)
    xc = x - mu
    var = jnp.mean(xc * xc, axis=-1, keepdims=True)
    return xc * lax.rsqrt(var + _LN_EPS) * g + b


def _erf_f32(x):
    # TODO(synk): exact lax.erf lowering in Mosaic is not guaranteed; this rational
    # approximation (Abramowitz & Stegun 7.1.26, |err| < 1.5e-7) uses abs/exp/
    # reciprocal/select which all lower cleanly (exp + rcp run on the EUP slot).
    a1, a2, a3, a4, a5 = (0.254829592, -0.284496736, 1.421413741,
                          -1.453152027, 1.061405429)
    p = 0.3275911
    ax = jnp.abs(x)
    t = pl.reciprocal(1.0 + p * ax, approx=True)
    poly = ((((a5 * t + a4) * t + a3) * t + a2) * t + a1) * t
    y = 1.0 - poly * jnp.exp(-ax * ax)
    return jnp.where(x >= 0.0, y, -y)


def _gelu_exact(x):
    return 0.5 * x * (1.0 + _erf_f32(x * (1.0 / math.sqrt(2.0))))


# ----------------------------------------------------------------------------
# Pallas kernels
# ----------------------------------------------------------------------------
def _ln_kernel(x_ref, g_ref, b_ref, o_ref):
    o_ref[...] = _layernorm(x_ref[...].astype(jnp.float32),
                            g_ref[...], b_ref[...]).astype(o_ref.dtype)


def ln_pallas(x2d, gamma, beta, out_dtype=jnp.float32):
    M, D = x2d.shape
    tm, M_pad = _rows_plan(M)
    out = pl.pallas_call(
        _ln_kernel,
        out_shape=jax.ShapeDtypeStruct((M_pad, D), out_dtype),
        grid=(M_pad // tm,),
        in_specs=[
            pl.BlockSpec((tm, D), lambda i: (i, 0)),
            pl.BlockSpec((1, D), lambda i: (0, 0)),
            pl.BlockSpec((1, D), lambda i: (0, 0)),
        ],
        out_specs=pl.BlockSpec((tm, D), lambda i: (i, 0)),
        compiler_params=_cparams(("parallel",)),
    )(_pad_rows(x2d.astype(jnp.float32), M_pad),
      gamma.reshape(1, D).astype(jnp.float32),
      beta.reshape(1, D).astype(jnp.float32))
    return out[:M] if M_pad != M else out


def _linear_kernel(x_ref, w_ref, wb_ref, o_ref):
    y = jnp.dot(x_ref[...].astype(jnp.bfloat16), w_ref[...],
                preferred_element_type=jnp.float32) + wb_ref[...]
    o_ref[...] = y.astype(o_ref.dtype)


def linear_pallas(x2d, w, wb, out_dtype=jnp.float32):
    M, D = x2d.shape
    N = w.shape[1]
    tm, M_pad = _rows_plan(M)
    out = pl.pallas_call(
        _linear_kernel,
        out_shape=jax.ShapeDtypeStruct((M_pad, N), out_dtype),
        grid=(M_pad // tm,),
        in_specs=[
            pl.BlockSpec((tm, D), lambda i: (i, 0)),
            pl.BlockSpec((D, N), lambda i: (0, 0)),
            pl.BlockSpec((1, N), lambda i: (0, 0)),
        ],
        out_specs=pl.BlockSpec((tm, N), lambda i: (i, 0)),
        compiler_params=_cparams(("parallel",)),
    )(_pad_rows(x2d.astype(jnp.float32), M_pad),
      w.astype(jnp.bfloat16),
      wb.reshape(1, N).astype(jnp.float32))
    return out[:M] if M_pad != M else out


def _ln_linear_kernel(x_ref, g_ref, b_ref, w_ref, wb_ref, o_ref):
    h = _layernorm(x_ref[...].astype(jnp.float32), g_ref[...], b_ref[...])
    y = jnp.dot(h.astype(jnp.bfloat16), w_ref[...],
                preferred_element_type=jnp.float32) + wb_ref[...]
    o_ref[...] = y.astype(o_ref.dtype)


def ln_linear_pallas(x2d, gamma, beta, w, wb, out_dtype=jnp.float32):
    """Fused LayerNorm(eps=1e-5) + Linear.  x2d: (M, D), w: (D, N), wb: (N,)."""
    M, D = x2d.shape
    N = w.shape[1]
    tm, M_pad = _rows_plan(M)
    out = pl.pallas_call(
        _ln_linear_kernel,
        out_shape=jax.ShapeDtypeStruct((M_pad, N), out_dtype),
        grid=(M_pad // tm,),
        in_specs=[
            pl.BlockSpec((tm, D), lambda i: (i, 0)),
            pl.BlockSpec((1, D), lambda i: (0, 0)),
            pl.BlockSpec((1, D), lambda i: (0, 0)),
            pl.BlockSpec((D, N), lambda i: (0, 0)),
            pl.BlockSpec((1, N), lambda i: (0, 0)),
        ],
        out_specs=pl.BlockSpec((tm, N), lambda i: (i, 0)),
        compiler_params=_cparams(("parallel",)),
    )(_pad_rows(x2d.astype(jnp.float32), M_pad),
      gamma.reshape(1, D).astype(jnp.float32),
      beta.reshape(1, D).astype(jnp.float32),
      w.astype(jnp.bfloat16),
      wb.reshape(1, N).astype(jnp.float32))
    return out[:M] if M_pad != M else out


def _ln_mlp_kernel(x_ref, g_ref, b_ref, w1_ref, b1_ref, w2_ref, b2_ref, o_ref):
    x = x_ref[...].astype(jnp.float32)
    h = _layernorm(x, g_ref[...], b_ref[...])
    h = jnp.dot(h.astype(jnp.bfloat16), w1_ref[...],
                preferred_element_type=jnp.float32) + b1_ref[...]
    h = _gelu_exact(h)
    y = x + jnp.dot(h.astype(jnp.bfloat16), w2_ref[...],
                    preferred_element_type=jnp.float32) + b2_ref[...]
    o_ref[...] = y.astype(o_ref.dtype)


def ln_mlp_pallas(x2d, gamma, beta, w1, b1, w2, b2):
    """Fused x + fc2(GELU(fc1(LN(x)))).  Intermediates never leave VMEM."""
    # TODO(synk): for very large D (ViT-L on v7x) the fc1/fc2 weights should get a
    # hidden-dim grid axis with pl.when init/finalize; bf16 weights keep ViT-L
    # within the 32 MiB scoped limit at the v7x row tile so we keep them resident.
    M, D = x2d.shape
    H = w1.shape[1]
    tm, M_pad = _rows_plan(M)
    out = pl.pallas_call(
        _ln_mlp_kernel,
        out_shape=jax.ShapeDtypeStruct((M_pad, D), jnp.float32),
        grid=(M_pad // tm,),
        in_specs=[
            pl.BlockSpec((tm, D), lambda i: (i, 0)),
            pl.BlockSpec((1, D), lambda i: (0, 0)),
            pl.BlockSpec((1, D), lambda i: (0, 0)),
            pl.BlockSpec((D, H), lambda i: (0, 0)),
            pl.BlockSpec((1, H), lambda i: (0, 0)),
            pl.BlockSpec((H, D), lambda i: (0, 0)),
            pl.BlockSpec((1, D), lambda i: (0, 0)),
        ],
        out_specs=pl.BlockSpec((tm, D), lambda i: (i, 0)),
        compiler_params=_cparams(("parallel",)),
    )(_pad_rows(x2d.astype(jnp.float32), M_pad),
      gamma.reshape(1, D).astype(jnp.float32),
      beta.reshape(1, D).astype(jnp.float32),
      w1.astype(jnp.bfloat16), b1.reshape(1, H).astype(jnp.float32),
      w2.astype(jnp.bfloat16), b2.reshape(1, D).astype(jnp.float32))
    return out[:M] if M_pad != M else out


def _attn_proj_kernel(scale, num_heads, x_ref, qkv_ref, w_ref, b_ref, o_ref):
    # One batch element per grid step; all heads handled in-kernel, then a single
    # D-wide out-projection matmul (full MXU contraction instead of Dh-wide).
    D = x_ref.shape[2]
    Dh = D // num_heads
    qkv = qkv_ref[0]                                  # (S, 3D) bf16
    head_outs = []
    for h in range(num_heads):                        # statically unrolled (small)
        qh = qkv[:, h * Dh:(h + 1) * Dh]
        kh = qkv[:, D + h * Dh:D + (h + 1) * Dh]
        vh = qkv[:, 2 * D + h * Dh:2 * D + (h + 1) * Dh]
        s = lax.dot_general(qh, kh, (((1,), (1,)), ((), ())),
                            preferred_element_type=jnp.float32) * scale
        s = s - jnp.max(s, axis=-1, keepdims=True)
        p = jnp.exp(s)
        p = p * pl.reciprocal(jnp.sum(p, axis=-1, keepdims=True), approx=True)
        head_outs.append(jnp.dot(p.astype(jnp.bfloat16), vh,
                                 preferred_element_type=jnp.float32))
    attn = jnp.concatenate(head_outs, axis=-1).astype(jnp.bfloat16)   # (S, D)
    out = (x_ref[0].astype(jnp.float32) + b_ref[...]
           + jnp.dot(attn, w_ref[...], preferred_element_type=jnp.float32))
    o_ref[0] = out.astype(o_ref.dtype)


def attn_proj_residual_pallas(x, qkv, proj_w, proj_b, num_heads):
    """x: (B, S, D) residual (f32), qkv: (B, S, 3D) bf16 -> x + proj(attention(qkv))."""
    B, S, D = x.shape
    scale = 1.0 / math.sqrt(D // num_heads)
    kern = partial(_attn_proj_kernel, scale, num_heads)
    return pl.pallas_call(
        kern,
        out_shape=jax.ShapeDtypeStruct((B, S, D), jnp.float32),
        grid=(B,),
        in_specs=[
            pl.BlockSpec((1, S, D), lambda i: (i, 0, 0)),
            pl.BlockSpec((1, S, 3 * D), lambda i: (i, 0, 0)),
            pl.BlockSpec((D, D), lambda i: (0, 0)),
            pl.BlockSpec((1, D), lambda i: (0, 0)),
        ],
        out_specs=pl.BlockSpec((1, S, D), lambda i: (i, 0, 0)),
        compiler_params=_cparams(("parallel",)),
    )(x.astype(jnp.float32), qkv.astype(jnp.bfloat16),
      proj_w.astype(jnp.bfloat16), proj_b.reshape(1, D).astype(jnp.float32))


def _patch_embed_kernel(x_ref, w_ref, b_ref, pe_ref, o_ref):
    y = (jnp.dot(x_ref[0], w_ref[...], preferred_element_type=jnp.float32)
         + b_ref[...] + pe_ref[...])
    o_ref[0] = y.astype(o_ref.dtype)


def _loss_kernel(p_ref, t_ref, m_ref, o_ref, num_acc, den_acc):
    @pl.when(pl.program_id(0) == 0)
    def _():
        num_acc[...] = jnp.zeros_like(num_acc)
        den_acc[...] = jnp.zeros_like(den_acc)

    d = p_ref[...] - t_ref[...]
    per_patch = jnp.mean(d * d, axis=-1, keepdims=True)     # (tm, 1)
    m = m_ref[...]                                           # (tm, 1)
    num_acc[...] += jnp.sum(per_patch * m, keepdims=True)
    den_acc[...] += jnp.sum(m, keepdims=True)

    @pl.when(pl.program_id(0) == pl.num_programs(0) - 1)
    def _():
        o_ref[...] = num_acc[...] / den_acc[...]


def masked_mse_loss_pallas(pred, target, mask):
    """pred/target: (N, L, P), mask: (N, L) -> scalar.  Row-tiled with accumulators."""
    N, L, P = pred.shape
    M = N * L
    p2 = pred.reshape(M, P).astype(jnp.float32)
    t2 = target.reshape(M, P).astype(jnp.float32)
    m2 = mask.reshape(M, 1).astype(jnp.float32)
    tm, M_pad = _rows_plan(M)
    p2 = _pad_rows(p2, M_pad)
    t2 = _pad_rows(t2, M_pad)
    m2 = _pad_rows(m2, M_pad)        # padded rows carry mask=0 -> contribute nothing
    out = pl.pallas_call(
        _loss_kernel,
        out_shape=jax.ShapeDtypeStruct((1, 1), jnp.float32),
        grid=(M_pad // tm,),
        in_specs=[
            pl.BlockSpec((tm, P), lambda i: (i, 0)),
            pl.BlockSpec((tm, P), lambda i: (i, 0)),
            pl.BlockSpec((tm, 1), lambda i: (i, 0)),
        ],
        out_specs=pl.BlockSpec((1, 1), lambda i: (0, 0)),
        scratch_shapes=[pltpu.VMEM((1, 1), jnp.float32),
                        pltpu.VMEM((1, 1), jnp.float32)],
        compiler_params=_cparams(("arbitrary",)),
    )(p2, t2, m2)
    return out[0, 0]


# ----------------------------------------------------------------------------
# Plain-JAX glue: bilinear grid_sample (padding='border', align_corners=True)
# ----------------------------------------------------------------------------
def grid_sample_bilinear(t, grid):
    """t: (1, C, Hin, Win), grid: (1, Hg, Wg, 2), [...,0]=x(width), [...,1]=y(height)."""
    _, C, Hin, Win = t.shape
    x = grid[0, ..., 0]
    y = grid[0, ..., 1]
    ix = jnp.clip((x + 1.0) * 0.5 * (Win - 1), 0.0, Win - 1)
    iy = jnp.clip((y + 1.0) * 0.5 * (Hin - 1), 0.0, Hin - 1)
    ix0f = jnp.floor(ix)
    iy0f = jnp.floor(iy)
    wx = ix - ix0f
    wy = iy - iy0f
    ix0 = ix0f.astype(jnp.int32)
    iy0 = iy0f.astype(jnp.int32)
    ix1 = jnp.minimum(ix0 + 1, Win - 1)
    iy1 = jnp.minimum(iy0 + 1, Hin - 1)
    tt = t[0]  # (C, Hin, Win)

    def g(iy_, ix_):
        return tt[:, iy_, ix_]  # (C, Hg, Wg)

    out = (g(iy0, ix0) * (1 - wy) * (1 - wx)
           + g(iy0, ix1) * (1 - wy) * wx
           + g(iy1, ix0) * wy * (1 - wx)
           + g(iy1, ix1) * wy * wx)
    return out[None]  # (1, C, Hg, Wg)


# ----------------------------------------------------------------------------
# Parameter init (deterministic; matmul weights stored pre-transposed (in,out) bf16)
# ----------------------------------------------------------------------------
def xavier_uniform(key, out_f, in_f):
    limit = math.sqrt(6.0 / (in_f + out_f))
    return jax.random.uniform(key, (out_f, in_f), jnp.float32, -limit, limit)


def init_block_params(key, dim, mlp_ratio):
    hid = int(dim * mlp_ratio)
    ks = jax.random.split(key, 4)
    return dict(
        ln1_g=jnp.ones((dim,), jnp.float32), ln1_b=jnp.zeros((dim,), jnp.float32),
        qkv_w=xavier_uniform(ks[0], 3 * dim, dim).T.astype(jnp.bfloat16),   # (D, 3D)
        qkv_b=jnp.zeros((3 * dim,), jnp.float32),
        proj_w=xavier_uniform(ks[1], dim, dim).T.astype(jnp.bfloat16),      # (D, D)
        proj_b=jnp.zeros((dim,), jnp.float32),
        ln2_g=jnp.ones((dim,), jnp.float32), ln2_b=jnp.zeros((dim,), jnp.float32),
        fc1_w=xavier_uniform(ks[2], hid, dim).T.astype(jnp.bfloat16),       # (D, 4D)
        fc1_b=jnp.zeros((hid,), jnp.float32),
        fc2_w=xavier_uniform(ks[3], dim, hid).T.astype(jnp.bfloat16),       # (4D, D)
        fc2_b=jnp.zeros((dim,), jnp.float32),
    )


def block_forward(x, p, num_heads):
    """timm ViT Block as 3 fused pallas_calls:
       qkv = (LN1 + QKV, bf16 out);  x += proj(attn(qkv));  x += fc2(GELU(fc1(LN2(x))))."""
    B, S, D = x.shape
    qkv = ln_linear_pallas(x.reshape(B * S, D), p['ln1_g'], p['ln1_b'],
                           p['qkv_w'], p['qkv_b'],
                           out_dtype=jnp.bfloat16).reshape(B, S, 3 * D)
    x = attn_proj_residual_pallas(x, qkv, p['proj_w'], p['proj_b'], num_heads)
    x = ln_mlp_pallas(x.reshape(B * S, D), p['ln2_g'], p['ln2_b'],
                      p['fc1_w'], p['fc1_b'], p['fc2_w'], p['fc2_b']).reshape(B, S, D)
    return x


# ----------------------------------------------------------------------------
# The model
# ----------------------------------------------------------------------------
class MaskedAutoencoderViTPallas:
    def __init__(self, img_size=32, patch_size=8, in_chans=3, embed_dim=32, depth=2,
                 num_heads=4, decoder_embed_dim=32, decoder_depth=1, decoder_num_heads=4,
                 mlp_ratio=4.0, norm_pix_loss=False, seed=0):
        self.img_size = img_size
        self.patch_size = patch_size
        self.in_chans = in_chans
        self.embed_dim = embed_dim
        self.num_heads = num_heads
        self.decoder_embed_dim = decoder_embed_dim
        self.decoder_num_heads = decoder_num_heads
        self.norm_pix_loss = norm_pix_loss
        self.grid_size = img_size // patch_size          # reference hardcodes 224//p; same
        self.num_patches = self.grid_size ** 2           # quantity for its own config

        key = jax.random.PRNGKey(seed)
        keys = jax.random.split(key, 6 + depth + decoder_depth)

        self.pos_embed = jnp.asarray(
            get_2d_sincos_pos_embed(embed_dim, self.grid_size, cls_token=True), jnp.float32)[None]
        self.decoder_pos_embed = jnp.asarray(
            get_2d_sincos_pos_embed(decoder_embed_dim, self.grid_size, cls_token=True), jnp.float32)[None]

        self.cls_token = 0.02 * jax.random.normal(keys[0], (1, 1, embed_dim), jnp.float32)
        self.mask_token = 0.02 * jax.random.normal(keys[1], (1, 1, decoder_embed_dim), jnp.float32)

        # Patch-embed conv weight stored flattened & pre-transposed: (C*p*p, D), bf16.
        self.conv_w2d = xavier_uniform(keys[2], embed_dim,
                                       in_chans * patch_size * patch_size).T.astype(jnp.bfloat16)
        self.conv_b = jnp.zeros((embed_dim,), jnp.float32)

        self.blocks = [init_block_params(keys[3 + i], embed_dim, mlp_ratio) for i in range(depth)]
        self.norm_g = jnp.ones((embed_dim,), jnp.float32)
        self.norm_b = jnp.zeros((embed_dim,), jnp.float32)

        k_off = 3 + depth
        self.dec_embed_w = xavier_uniform(keys[k_off], decoder_embed_dim,
                                          embed_dim).T.astype(jnp.bfloat16)          # (E, Dd)
        self.dec_embed_b = jnp.zeros((decoder_embed_dim,), jnp.float32)
        self.dec_blocks = [init_block_params(keys[k_off + 1 + i], decoder_embed_dim, mlp_ratio)
                           for i in range(decoder_depth)]
        self.dec_norm_g = jnp.ones((decoder_embed_dim,), jnp.float32)
        self.dec_norm_b = jnp.zeros((decoder_embed_dim,), jnp.float32)
        self.dec_pred_w = xavier_uniform(keys[k_off + 1 + decoder_depth],
                                         patch_size ** 2 * in_chans,
                                         decoder_embed_dim).T.astype(jnp.bfloat16)   # (Dd, P)
        self.dec_pred_b = jnp.zeros((patch_size ** 2 * in_chans,), jnp.float32)

    # ----- PatchEmbed (Conv2d k=p stride=p == patch extract + matmul) fused with pos-embed add -----
    def patch_embed_with_pe(self, imgs, pe2d):
        B, C, H, W = imgs.shape
        p = self.patch_size
        Hg, Wg = H // p, W // p
        HW = Hg * Wg
        D = self.embed_dim
        x = imgs.reshape(B, C, Hg, p, Wg, p)
        x = jnp.transpose(x, (0, 2, 4, 1, 3, 5)).reshape(B, HW, C * p * p)
        return pl.pallas_call(
            _patch_embed_kernel,
            out_shape=jax.ShapeDtypeStruct((B, HW, D), jnp.float32),
            grid=(B,),
            in_specs=[
                pl.BlockSpec((1, HW, C * p * p), lambda i: (i, 0, 0)),
                pl.BlockSpec((C * p * p, D), lambda i: (0, 0)),
                pl.BlockSpec((1, D), lambda i: (0, 0)),
                pl.BlockSpec((HW, D), lambda i: (0, 0)),
            ],
            out_specs=pl.BlockSpec((1, HW, D), lambda i: (i, 0, 0)),
            compiler_params=_cparams(("parallel",)),
        )(x.astype(jnp.bfloat16), self.conv_w2d.astype(jnp.bfloat16),
          self.conv_b.reshape(1, D).astype(jnp.float32), pe2d.astype(jnp.float32))

    # ----- sample_pe: bilinear resample of the (non-cls) pos-embed grid -----
    def sample_pe(self, img, pe):
        p = self.patch_size
        H = img.shape[2] // p
        W = img.shape[3] // p
        G = self.grid_size
        D = pe.shape[-1]
        reshaped_pe = jnp.transpose(pe[0, 1:].reshape(1, G, G, D), (0, 3, 1, 2))  # (1, D, G, G)
        XX, YY = jnp.meshgrid(jnp.linspace(-1.0, 1.0, H), jnp.linspace(-1.0, 1.0, W), indexing='ij')
        coords = jnp.stack([XX, YY], axis=-1)[None]            # (1, H, W, 2)
        grid = jnp.transpose(coords, (0, 2, 1, 3))             # coords.permute(0,2,1,3)
        sampled = grid_sample_bilinear(reshaped_pe, grid)      # (1, D, W, H)
        return sampled.reshape(D, H * W).T[None]               # (1, H*W, D)

    def random_masking(self, x, mask_ratio, key):
        N, L, D = x.shape
        len_keep = int(L * (1 - mask_ratio))
        noise = jax.random.uniform(key, (N, L), jnp.float32)
        ids_shuffle = jnp.argsort(noise, axis=1)
        ids_restore = jnp.argsort(ids_shuffle, axis=1)
        ids_keep = ids_shuffle[:, :len_keep]
        x_masked = jnp.take_along_axis(x, ids_keep[:, :, None], axis=1)
        mask = jnp.concatenate(
            [jnp.zeros((N, len_keep), jnp.float32), jnp.ones((N, L - len_keep), jnp.float32)], axis=1)
        mask = jnp.take_along_axis(mask, ids_restore, axis=1)
        return x_masked, mask, ids_restore

    def forward_encoder(self, img, mask_ratio, key):
        B = img.shape[0]
        D = self.embed_dim
        pe2d = self.sample_pe(img, self.pos_embed)[0]          # (HW, D)
        x = self.patch_embed_with_pe(img, pe2d)                # patch-embed + pos-embed add fused
        x, mask, ids_restore = self.random_masking(x, mask_ratio, key)
        cls_token = self.cls_token + self.pos_embed[:, :1, :]
        cls_tokens = jnp.broadcast_to(cls_token, (B, 1, D))
        x = jnp.concatenate([cls_tokens, x], axis=1)
        for p in self.blocks:
            x = block_forward(x, p, self.num_heads)
        Bx, Sx, _ = x.shape
        x = ln_pallas(x.reshape(Bx * Sx, D), self.norm_g, self.norm_b).reshape(Bx, Sx, D)
        return x, mask, ids_restore

    def forward_decoder(self, x, ids_restore, img):
        B, S, E = x.shape
        Dd = self.decoder_embed_dim
        x = linear_pallas(x.reshape(B * S, E), self.dec_embed_w,
                          self.dec_embed_b).reshape(B, S, Dd)
        L = ids_restore.shape[1]
        mask_tokens = jnp.broadcast_to(self.mask_token, (B, L + 1 - S, Dd))
        x_ = jnp.concatenate([x[:, 1:, :], mask_tokens], axis=1)
        x_ = jnp.take_along_axis(x_, ids_restore[:, :, None], axis=1)
        x = jnp.concatenate([x[:, :1, :], x_], axis=1)
        cls_token = x[:, :1] + self.decoder_pos_embed[0, :1]
        x = x[:, 1:] + self.sample_pe(img, self.decoder_pos_embed)
        x = jnp.concatenate([cls_token, x], axis=1)
        for p in self.dec_blocks:
            x = block_forward(x, p, self.decoder_num_heads)
        Bx, Sx, _ = x.shape
        # fused: decoder norm + decoder_pred linear
        x = ln_linear_pallas(x.reshape(Bx * Sx, Dd), self.dec_norm_g, self.dec_norm_b,
                             self.dec_pred_w, self.dec_pred_b).reshape(Bx, Sx, -1)
        return x[:, 1:, :]

    def patchify(self, imgs):
        p = self.patch_size
        B = imgs.shape[0]
        h = w = imgs.shape[2] // p
        x = imgs.reshape(B, 3, h, p, w, p)
        x = jnp.transpose(x, (0, 2, 4, 3, 5, 1))               # nchpwq -> nhwpqc
        return x.reshape(B, h * w, p * p * 3)

    def forward_loss(self, imgs, pred, mask):
        target = self.patchify(imgs)
        if self.norm_pix_loss:
            mean = target.mean(axis=-1, keepdims=True)
            var = target.var(axis=-1, keepdims=True)
            target = (target - mean) / (var + 1e-6) ** 0.5
        return masked_mse_loss_pallas(pred, target, mask)

    def forward(self, imgs, mask_ratio=0.75, mask_key=None):
        if mask_key is None:
            mask_key = jax.random.PRNGKey(1)
        latent, mask, ids_restore = self.forward_encoder(imgs, mask_ratio, mask_key)
        pred = self.forward_decoder(latent, ids_restore, imgs)
        loss = self.forward_loss(imgs, pred, mask)
        return loss, pred, mask


# ----------------------------------------------------------------------------
if __name__ == "__main__":
    key = jax.random.PRNGKey(0)
    k_img, k_mask = jax.random.split(key)

    model = MaskedAutoencoderViTPallas(
        img_size=32, patch_size=8, in_chans=3, embed_dim=32, depth=2, num_heads=4,
        decoder_embed_dim=32, decoder_depth=1, decoder_num_heads=4, mlp_ratio=4.0, seed=0)

    imgs = jax.random.normal(k_img, (2, 3, 32, 32), jnp.float32)   # NCHW, like PyTorch
    loss, pred, mask = model.forward(imgs, mask_ratio=0.75, mask_key=k_mask)

    jax.block_until_ready((loss, pred, mask))
    assert pred.shape == (2, 16, 8 * 8 * 3)
    assert mask.shape == (2, 16)
    assert bool(jnp.isfinite(loss))
    print("KERNEL_OK")
</pallas_src>

<mosaic_0001>
module attributes {stable_mosaic.version = 11 : i64} {
  func.func @_patch_embed_kernel(%arg0: i32, %arg1: memref<1x16x192xbf16, #tpu.memory_space<vmem>>, %arg2: memref<192x32xbf16, #tpu.memory_space<vmem>>, %arg3: memref<1x32xf32, #tpu.memory_space<vmem>>, %arg4: memref<16x32xf32, #tpu.memory_space<vmem>>, %arg5: memref<1x16x32xf32, #tpu.memory_space<vmem>>) attributes {dimension_semantics = [#tpu.dimension_semantics<parallel>], iteration_bounds = array<i64: 2>, scalar_prefetch = 0 : i64, scratch_operands = 0 : i64, tpu.core_type = #tpu.core_type<tc>, window_params = [{transform_indices = @transform_0, window_bounds = array<i64: 1, 16, 192>}, {pipeline_mode = #tpu.pipeline_mode<synchronous>, transform_indices = @transform_1, window_bounds = array<i64: 192, 32>}, {pipeline_mode = #tpu.pipeline_mode<synchronous>, transform_indices = @transform_2, window_bounds = array<i64: 1, 32>}, {pipeline_mode = #tpu.pipeline_mode<synchronous>, transform_indices = @transform_3, window_bounds = array<i64: 16, 32>}, {transform_indices = @transform_4, window_bounds = array<i64: 1, 16, 32>}]} {
    %c0 = arith.constant 0 : index
    %c0_0 = arith.constant 0 : index
    %c0_1 = arith.constant 0 : index
    %0 = vector.load %arg1[%c0, %c0_0, %c0_1] : memref<1x16x192xbf16, #tpu.memory_space<vmem>>, vector<1x16x192xbf16>
    %1 = vector.shape_cast %0 : vector<1x16x192xbf16> to vector<16x192xbf16>
    %c0_2 = arith.constant 0 : index
    %c0_3 = arith.constant 0 : index
    %2 = vector.load %arg2[%c0_2, %c0_3] : memref<192x32xbf16, #tpu.memory_space<vmem>>, vector<192x32xbf16>
    %cst = arith.constant dense<0.000000e+00> : vector<16x32xf32>
    %3 = tpu.matmul %1, %2, %cst {dimension_numbers = #tpu.dot_dimension_numbers<[1], [0], [0], [1], [0, 0, 1, 1], [], []>} : vector<16x192xbf16>, vector<192x32xbf16>, vector<16x32xf32> -> vector<16x32xf32>
    %c0_4 = arith.constant 0 : index
    %c0_5 = arith.constant 0 : index
    %4 = vector.load %arg3[%c0_4, %c0_5] : memref<1x32xf32, #tpu.memory_space<vmem>>, vector<1x32xf32>
    %5 = vector.broadcast %4 : vector<1x32xf32> to vector<16x32xf32>
    %6 = arith.addf %3, %5 : vector<16x32xf32>
    %c0_6 = arith.constant 0 : index
    %c0_7 = arith.constant 0 : index
    %7 = vector.load %arg4[%c0_6, %c0_7] : memref<16x32xf32, #tpu.memory_space<vmem>>, vector<16x32xf32>
    %8 = arith.addf %6, %7 : vector<16x32xf32>
    %c0_8 = arith.constant 0 : index
    %c0_9 = arith.constant 0 : index
    %c0_10 = arith.constant 0 : index
    %9 = vector.load %arg5[%c0_8, %c0_9, %c0_10] : memref<1x16x32xf32, #tpu.memory_space<vmem>>, vector<1x16x32xf32>
    %10 = vector.shape_cast %9 : vector<1x16x32xf32> to vector<16x32xf32>
    %11 = vector.shape_cast %8 : vector<16x32xf32> to vector<1x16x32xf32>
    tpu.vector_store %arg5[%c0_8, %c0_9, %c0_10], %11 {strides = array<i32>} : memref<1x16x32xf32, #tpu.memory_space<vmem>>, vector<1x16x32xf32>,
    return
  }
  func.func @transform_0(%arg0: i32) -> (i32, i32, i32) {
    %c0_i32 = arith.constant 0 : i32
    %c0_i32_0 = arith.constant 0 : i32
    %c0_i32_1 = arith.constant 0 : i32
    return %arg0, %c0_i32, %c0_i32_0 : i32, i32, i32
  }
  func.func @transform_1(%arg0: i32) -> (i32, i32) {
    %c0_i32 = arith.constant 0 : i32
    %c0_i32_0 = arith.constant 0 : i32
    %c0_i32_1 = arith.constant 0 : i32
    return %c0_i32, %c0_i32_0 : i32, i32
  }
  func.func @transform_2(%arg0: i32) -> (i32, i32) {
    %c0_i32 = arith.constant 0 : i32
    %c0_i32_0 = arith.constant 0 : i32
    %c0_i32_1 = arith.constant 0 : i32
    return %c0_i32, %c0_i32_0 : i32, i32
  }
  func.func @transform_3(%arg0: i32) -> (i32, i32) {
    %c0_i32 = arith.constant 0 : i32
    %c0_i32_0 = arith.constant 0 : i32
    %c0_i32_1 = arith.constant 0 : i32
    return %c0_i32, %c0_i32_0 : i32, i32
  }
  func.func @transform_4(%arg0: i32) -> (i32, i32, i32) {
    %c0_i32 = arith.constant 0 : i32
    %c0_i32_0 = arith.constant 0 : i32
    %c0_i32_1 = arith.constant 0 : i32
    return %arg0, %c0_i32, %c0_i32_0 : i32, i32, i32
  }
}

</mosaic_0001>

<bundles_post_ra>
// kernel: tpu_custom_call.1
= control target key start
LH: loop header
LB: loop body
LE: loop exit
PB: predicated region body
PF: predicated region fallthrough
CT: control target
= control target key end

     0   :  { %9 = vsyncpa [#allocation3], 0  ;;  %s767_s0 = inlined_call_operand.vmem [shape: bf16[2,16,192], index: 0, kind: input, shape index: {}]   ;;  %s768_s1 = inlined_call_operand.vmem [shape: bf16[192,32], index: 1, kind: input, shape index: {}]   ;;  %s769_s2 = inlined_call_operand.vmem [shape: f32[1,32], index: 2, kind: input, shape index: {}]   ;;  %s770_s3 = inlined_call_operand.vmem [shape: f32[16,32], index: 3, kind: input, shape index: {}]   ;;  %s771_s4 = inlined_call_operand.hbm [shape: f32[2,16,32], index: 4, kind: output, shape index: {}]  }
   0x1   :  { %11 = vsyncpa [#allocation3 + $0x1], 0  ;;  %s619_s15 = smov 0   ;;  %s621_s16 = smov 0  }
   0x2   :  { %s623_s17 = smov 0   ;;  %s625_s18 = smov 0  }
   0x3 LB: > { %s640_s19 = sadd.s32 4294967295, %s588_s18   ;;  %s439_s20 = sadd.s32 4294967294, %s588_s18   ;;  %s588_s18 = sphi %s625_s18, %s777_s18   ;;  %s584_s17 = sphi %s623_s17, %s776_s17   ;;  %s580_s16 = sphi %s621_s16, %s775_s16   ;;  %s576_s15 = sphi %s619_s15, %s774_s15  }
   0x4   : > { %s644_s21 = sadd.s32 1, %s588_s18   ;;  %s113_s22 = sadd.s32 1, %s584_s17 }
   0x5   : > { %s110_s23 = ssub.s32 %s588_s18, %s644_s21  ;;  %p123_p0 = scmp.ne.s32.totalorder %s584_s17, %s580_s16 }
   0x6   : > { %p111_p1 = scmp.eq.s32.totalorder %s110_s23, 0  ;;  %p124_p2 = scmp.eq.s32.totalorder %s640_s19, 1 }
   0x7   : > { %p129_p3 = scmp.ne.s32.totalorder %s580_s16, %s576_s15  ;;  %p130_p4 = scmp.eq.s32.totalorder %s439_s20, 1 }
   0x8   : > { %s655_s24 = scalar_select %p111_p1, %s584_s17, %s113_s22  }
   0x9   : > { %p657_p5 = por %p124_p2, %p123_p0  ;;  %p661_p6 = por %p130_p4, %p129_p3 }
   0xa   : > { %p442_p7 = scmp.ge.s32.totalorder %s588_s18, 1  ;;  %p165_p8 = scmp.lt.s32.totalorder %s588_s18, 3 }
   0xc   : > { %p166_p9 = pnand %p442_p7, %p165_p8 }
   0xd   : > { %v511_v0 = vld [vmem:[%s768_s1] sm:$0xff] (!%p166_p9)   ;;  %v590_v1 = vmov (!%p166_p9), 0   ;;  %p191_p10 = scmp.lt.s32.totalorder (!%p166_p9), %s640_s19, 1  ;;  %v512_v2 = vld [vmem:[%s768_s1 + $0x8] sm:$0xff] (!%p166_p9)   ;;  %v513_v3 = vld [vmem:[%s768_s1 + $0x10] sm:$0xff] (!%p166_p9)   ;;  %vm311_vm0 = vcmask (!%p166_p9), 523264  }
   0xe   : > { %169 = sbr.rel (%p166_p9) target bundleno = 295 (0x127), region = 36  ;;  %315 = vmatprep.subr.bf16.mxu0 (!%p166_p9), %v590_v1  ;;  %v514_v4 = vld [vmem:[%s768_s1 + $0x18] sm:$0xff] (!%p166_p9)   ;;  %v515_v6 = vld [vmem:[%s768_s1 + $0x20] sm:$0xff] (!%p166_p9)   ;;  %v516_v7 = vld [vmem:[%s768_s1 + $0x28] sm:$0xff] (!%p166_p9)   ;;  %s188_s14 = sand.u32 (!%p166_p9), 1, %s580_s16   ;;  %vm360_vm1 = vcmask (!%p166_p9), 261120  }
   0xf   : > { %316 = vmatpush1.bf16.msra.mxu0 (!%p166_p9), %v511_v0  ;;  %v517_v8 = vld [vmem:[%s768_s1 + $0x30] sm:$0xff] (!%p166_p9)   ;;  %v518_v9 = vld [vmem:[%s768_s1 + $0x38] sm:$0xff] (!%p166_p9)   ;;  %v519_v10 = vld [vmem:[%s768_s1 + $0x40] sm:$0xff] (!%p166_p9)   ;;  %s443_s20 = sshll.u32 (!%p166_p9), %s188_s14, 4  ;;  %s591_s11 = smov (!%p166_p9), [#allocation2]  }
  0x10   : > { %317 = vmatprep.subr.bf16.mxu0 (!%p166_p9), %v590_v1  ;;  %v520_v11 = vld [vmem:[%s768_s1 + $0x48] sm:$0xff] (!%p166_p9)   ;;  %v521_v12 = vld [vmem:[%s768_s1 + $0x50] sm:$0xff] (!%p166_p9)   ;;  %v522_v13 = vld [vmem:[%s768_s1 + $0x58] sm:$0xff] (!%p166_p9)   ;;  %s190_s29 = scalar_lea.vmem (!%p166_p9), [#allocation2], %s443_s20  ;;  %s530_s12 = sshll.u32 (!%p166_p9), %s591_s11, 4  ;;  %s531_s12 = int_to_ptr.vmem [resolvable:$false] %s530_s12 }
  0x11   : > { %v446_v15 = vld [vmem:[%s769_s2] ss:$0 sm:$0xff] (!%p166_p9)  ;;  %s377_s30 = sshll.u32 (!%p166_p9), %s190_s29, 4  ;;  %v357_v21 = vld [vmem:[%s770_s3 + $0x8] sm:$0xff] (!%p166_p9)  ;;  %s532_s20 = scalar_lea.vmem (!%p166_p9), %s531_s12, 512  ;;  %s724_s30 = int_to_ptr.vmem [resolvable:$true] %s377_s30 }
  0x12   : > { %v356_v17 = vld [vmem:[%s770_s3] sm:$0xff] (!%p166_p9)  ;;  %s526_s10 = scalar_lea.vmem (!%p166_p9), %s724_s30, 256  ;;  %p533_p0 = scmp.lt.s32.totalorder (!%p166_p9), %s724_s30, %s531_s12 }
  0x13   : > { %318 = vmatpush1.bf16.msra.mxu0 (!%p166_p9), %v512_v2  ;;  %p527_p11 = scmp.ne.s32.totalorder (!%p166_p9), %s724_s30, %s526_s10  ;;  %p534_p1 = scmp.lt.s32.totalorder (!%p166_p9), %s532_s20, %s526_s10 }
  0x14   : > { %319 = vmatprep.subr.bf16.mxu0 (!%p166_p9), %v590_v1 }
  0x15   : > { %s192_s5 = scalar_select %p191_p10, %s640_s19, 1 }
  0x16   : > { %p528_p12 = pnand %p527_p11, %p657_p5  ;;  %p535_p2 = por %p534_p1, %p533_p0 }
  0x17   : > { %s467_s8 = sshll.u32 %s192_s5, 4  ;;  %320 = vmatpush1.bf16.msra.mxu0 %v513_v3  ;;  %s468_s5 = sshll.u32 %s640_s19, 8 }
  0x18   : > { %s195_s13 = scalar_lea.vmem %s767_s0, %s467_s8  ;;  %321 = vmatprep.subr.bf16.mxu0 %v590_v1  ;;  %s722_s9 = scalar_lea.hbm %s771_s4, %s468_s5 }
  0x19   : > { %v525_v5 = vld [vmem:[%s195_s13 + $0x4] ss:$8 sps:$4 sm:$0xff]   ;;  %v523_v14 = vld [vmem:[%s195_s13] ss:$8 sps:$4 sm:$0xff]   ;;  %s726_s19 = scalar_lea.sflag [#allocation3], %s188_s14  ;;  %p529_p13 = pneg %p528_p12 }
  0x1a   : > { %461 = vmatprep.mubr.msk.bf16.mxu0 %vm311_vm0, %v525_v5 }
  0x1b   : > { %322 = vmatpush1.bf16.msra.mxu0 %v514_v4  ;;  %p536_p3 = pnand %p535_p2, %p529_p13 }
  0x1c   : > { %323 = vmatprep.subr.bf16.mxu0 %v590_v1 }
  0x1f   : > { %324 = vmatpush1.bf16.msra.mxu0 %v515_v6 }
  0x20   : > { %325 = vmatprep.subr.bf16.mxu0 %v590_v1 }
  0x23   : > { %326 = vmatpush1.bf16.msra.mxu0 %v516_v7 }
  0x24   : > { %327 = vmatprep.subr.bf16.mxu0 %v590_v1 }
  0x27   : > { %328 = vmatpush1.bf16.msra.mxu0 %v517_v8 }
  0x28   : > { %329 = vmatprep.subr.bf16.mxu0 %v590_v1 }
  0x2b   : > { %330 = vmatpush1.bf16.msra.mxu0 %v518_v9 }
  0x2c   : > { %331 = vmatprep.subr.bf16.mxu0 %v590_v1 }
  0x2f   : > { %332 = vmatpush1.bf16.msra.mxu0 %v519_v10 }
  0x30   : > { %333 = vmatprep.subr.bf16.mxu0 %v590_v1 }
  0x33   : > { %334 = vmatpush1.bf16.msra.mxu0 %v520_v11 }
  0x34   : > { %335 = vmatprep.subr.bf16.mxu0 %v590_v1 }
  0x37   : > { %336 = vmatpush1.bf16.msra.mxu0 %v521_v12 }
  0x38   : > { %337 = vmatprep.subr.bf16.mxu0 %v590_v1 }
  0x3b   : > { %338 = vmatpush1.bf16.msra.mxu0 %v522_v13 }
  0x3e   : > { %348 = vmatmul.mubr.bf16.vlgmr.msra.gmra.mrb[0].mxu0 %v523_v14 }
 0x111   : > { %v349_v16 = vpop.f32.mrb[0].mxu0 }
 0x112   : > { %v350_v18 = vadd.f32 %v446_v15, %v349_v16  ;;  %v351_v19 = vpop.f32.mrb[1].mxu0 }
 0x113   : > { %v352_v20 = vpop.f32.mrb[2].mxu0 }
 0x114   : > { %v358_v22 = vadd.f32 %v356_v17, %v350_v18  ;;  %v353_v23 = vadd.f32 %v446_v15, %v352_v20  ;;  %v354_v24 = vpop.f32.mrb[3].mxu0 }
 0x116   : > { %361 = vst.msk [vmem:[%s190_s29] sm:$0xff] %vm360_vm1, %v358_v22  ;;  %v359_v25 = vadd.f32 %v357_v21, %v353_v23 }
 0x118   : > { %362 = vst.msk [vmem:[%s190_s29 + $0x8] sm:$0xff] %vm360_vm1, %v359_v25 }
 0x119   : > { %539 = shalt.err (!%p536_p3)
}
 0x11a   : > { %s540_s14 = scalar_lea.hbm %s722_s9, 256  ;;  %s544_s27 = scalar_lea.hbm %s771_s4, 512 }
 0x11b   : > { %p541_p4 = scmp.ne.s32.totalorder %s722_s9, %s540_s14  ;;  %p545_p9 = scmp.lt.u32.totalorder %s722_s9, %s771_s4 }
 0x11c   : > { %p546_p10 = scmp.lt.u32.totalorder %s544_s27, %s540_s14  ;;  %p548_p12 = scmp.lt.u32.totalorder %s540_s14, %s722_s9 }
 0x11d   : > { %p542_p7 = pnand %p541_p4, %p657_p5 }
 0x11e   : > { %p547_p11 = por %p546_p10, %p545_p9 }
 0x11f   : > { %p543_p8 = pneg %p542_p7 }
 0x120   : > { %p549_p13 = por %p548_p12, %p547_p11 }
 0x122   : > { %p550_p0 = pnand %p549_p13, %p543_p8 }
 0x124   : > { %553 = shalt.err (!%p550_p0)
}
 0x125   : > { %s592_s5 = smov 128   ;;  %s593_s13 = smov 8  }
 0x126   : > { %469 = dma.vmem_to_hbm [thread:$0]  (%p657_p5), %s724_s30, 256, %s722_s9, %s726_s19, %s592_s5, %s592_s5, %s593_s13  }
 0x127 PF: > { %p475_p1 = scmp.ge.s32.totalorder %s588_s18, 2  ;;  %s392_s6 = sand.u32 1, %s576_s15  }
 0x128   : > { %s393_s7 = scalar_lea.sflag [#allocation3], %s392_s6 }
 0x129   : > { %p472_p2 = pnand %p475_p1, %p661_p6 }
 0x12b   : > { %571 = dma.done.wait (!%p472_p2), %s393_s7, 256  }
 0x12c   : > { %573 = vsyncadd (!%p472_p2), %s393_s7, 4294967040  ;;  %p14_p3 = scmp.ge.s32.totalorder %s644_s21, 4   ;;  %s774_s15 = smov %s580_s16 }
 0x12d   : > { %s775_s16 = smov %s584_s17  ;;  %s776_s17 = smov %s655_s24 }
 0x12e   : > { %s777_s18 = smov %s644_s21  ;;  %16 = sbr.rel (!%p14_p3) target bundleno = 3 (0x3), region = 71 }
 0x135   :  { %398 = vsyncpa [#allocation3], 1 }
 0x136   :  { %400 = vsyncpa [#allocation3 + $0x1], 1 }

</bundles_post_ra>
